<compile_context>
chip_gen: v7x
topology: tpu7x:2x2x1
jax: 0.10.0
libtpu: 0.0.40
codegen_flags: <defaults>
</compile_context>

<pallas_src>
import functools

import jax
import jax.numpy as jnp
from jax.experimental import pallas as pl
from jax.experimental.pallas import tpu as pltpu

LANE = 128


def _round_up(v, m):
    return ((v + m - 1) // m) * m


def _pad2d(x, rows, cols):
    return jnp.pad(x, ((0, rows - x.shape[0]), (0, cols - x.shape[1])))


# ----------------------------- Pallas kernels ------------------------------ #

def _cheb_prop_kernel(a_ref, h_ref, t_ref, o_ref, acc_ref, *, alpha, beta):
    """Tiled Chebyshev propagation: out = alpha * (L_hat @ h) + beta * t.

    bf16 operands, f32 accumulation in a VMEM scratch; the k axis of the grid
    reduces over column tiles of L_hat.
    """
    kk = pl.program_id(1)

    @pl.when(kk == 0)
    def _init():
        acc_ref[...] = jnp.zeros_like(acc_ref)

    acc_ref[...] += jnp.dot(a_ref[...], h_ref[...],
                            preferred_element_type=jnp.float32)

    @pl.when(kk == pl.num_programs(1) - 1)
    def _finalize():
        res = alpha * acc_ref[...]
        if beta != 0.0:                      # static Python branch
            res = res + beta * t_ref[...].astype(jnp.float32)
        o_ref[...] = res.astype(o_ref.dtype)


def cheb_prop(l_pad, h_pad, t_pad, alpha, beta, *, tm, tk):
    """alpha * (L_hat @ h) + beta * t  for padded bf16 operands."""
    Np = l_pad.shape[0]
    Cp = h_pad.shape[1]
    kernel = functools.partial(_cheb_prop_kernel,
                               alpha=float(alpha), beta=float(beta))
    return pl.pallas_call(
        kernel,
        out_shape=jax.ShapeDtypeStruct((Np, Cp), jnp.bfloat16),
        grid=(Np // tm, Np // tk),
        in_specs=[
            pl.BlockSpec((tm, tk), lambda i, k: (i, k)),   # L_hat tile
            pl.BlockSpec((tk, Cp), lambda i, k: (k, 0)),   # h (reduction tile)
            pl.BlockSpec((tm, Cp), lambda i, k: (i, 0)),   # T_{k-2}
        ],
        out_specs=pl.BlockSpec((tm, Cp), lambda i, k: (i, 0)),
        scratch_shapes=[pltpu.VMEM((tm, Cp), jnp.float32)],
        compiler_params=pltpu.CompilerParams(
            dimension_semantics=("parallel", "arbitrary")),
    )(l_pad, h_pad, t_pad)


def _cheb_combine_kernel(tx_ref, wt_ref, b_ref, o_ref, *, K, relu):
    """out = sum_k Tx[k] @ Wt[k] + bias (optionally fused ReLU)."""
    acc = jnp.zeros(o_ref.shape, jnp.float32)
    for k in range(K):                       # K is small & static -> unrolled
        acc = acc + jnp.dot(tx_ref[k], wt_ref[k],
                            preferred_element_type=jnp.float32)
    acc = acc + b_ref[...]                   # bias added once, in writeback
    if relu:
        acc = jnp.maximum(acc, 0.0)
    o_ref[...] = acc.astype(o_ref.dtype)


def cheb_combine(tx_stack, wt_stack, bias, *, relu, tm):
    K, Np, Cpi = tx_stack.shape
    Cpo = wt_stack.shape[2]
    kernel = functools.partial(_cheb_combine_kernel, K=K, relu=relu)
    return pl.pallas_call(
        kernel,
        out_shape=jax.ShapeDtypeStruct((Np, Cpo), jnp.float32),
        grid=(Np // tm,),
        in_specs=[
            pl.BlockSpec((K, tm, Cpi), lambda i: (0, i, 0)),   # Tx row tile
            pl.BlockSpec((K, Cpi, Cpo), lambda i: (0, 0, 0)),  # all W_k^T
            pl.BlockSpec((1, Cpo), lambda i: (0, 0)),          # bias
        ],
        out_specs=pl.BlockSpec((tm, Cpo), lambda i: (i, 0)),
        compiler_params=pltpu.CompilerParams(
            dimension_semantics=("parallel",)),
    )(tx_stack, wt_stack, bias)


def cheb_conv_forward(l_pad, x_pad, wt_pad, bias_pad, K, *, relu, tm, tk):
    """One ChebConv layer on padded bf16 inputs; returns f32 [Np, Cpo]."""
    txs = [x_pad]                                            # T_0
    if K > 1:
        txs.append(cheb_prop(l_pad, x_pad, x_pad, 1.0, 0.0, tm=tm, tk=tk))
    for _ in range(2, K):                                    # T_k = 2 L T_{k-1} - T_{k-2}
        txs.append(cheb_prop(l_pad, txs[-1], txs[-2], 2.0, -1.0, tm=tm, tk=tk))
    tx_stack = jnp.stack(txs, axis=0)                        # [K, Np, Cpi] bf16
    return cheb_combine(tx_stack, wt_pad, bias_pad, relu=relu, tm=tm)


# ------------------------------- Glue (JAX) -------------------------------- #

def cheb_norm_dense(edge_index, edge_weight, num_nodes, lambda_max=2.0):
    """Dense L_hat = (2/lambda_max)(I - D^{-1/2} A D^{-1/2}) - I (PyG ChebConv)."""
    N = num_nodes
    src, dst = edge_index[0], edge_index[1]
    w = jnp.where(src == dst, 0.0, edge_weight.astype(jnp.float32))  # drop self-loops
    deg = jnp.zeros((N,), jnp.float32).at[src].add(w)
    dis = jnp.where(deg > 0, 1.0 / jnp.sqrt(deg), 0.0)
    a_norm = jnp.zeros((N, N), jnp.float32).at[dst, src].add(dis[src] * w * dis[dst])
    eye = jnp.eye(N, dtype=jnp.float32)
    lap = eye - a_norm
    return (2.0 / lambda_max) * lap - eye


class MyChebyNetPallas:
    """Mirrors MyChebyNet(in, hidden, out, K): ChebConv -> ReLU -> dropout -> ChebConv."""

    def __init__(self, in_channels, hidden_channels, out_channels, K, key,
                 dropout=0.5):
        self.K = K
        self.out_channels = out_channels
        self.dropout = dropout

        kw1, kw2, kb1, kb2 = jax.random.split(key, 4)

        def glorot(k, shape):                 # [K, out, in]
            lim = (6.0 / (shape[1] + shape[2])) ** 0.5
            return jax.random.uniform(k, shape, jnp.float32, -lim, lim)

        self.w1 = glorot(kw1, (K, hidden_channels, in_channels))
        self.b1 = jax.random.uniform(kb1, (hidden_channels,), jnp.float32, -0.1, 0.1)
        self.w2 = glorot(kw2, (K, out_channels, hidden_channels))
        self.b2 = jax.random.uniform(kb2, (out_channels,), jnp.float32, -0.1, 0.1)

        # Lane-padded, transposed, bf16 parameter copies used by the kernels.
        self.Cpi1 = _round_up(in_channels, LANE)
        self.Cp_h = _round_up(hidden_channels, LANE)
        self.Cp_o = _round_up(out_channels, LANE)

        wt1 = jnp.transpose(self.w1, (0, 2, 1))               # [K, in, hidden]
        self.wt1_pad = jnp.pad(
            wt1, ((0, 0), (0, self.Cpi1 - in_channels),
                  (0, self.Cp_h - hidden_channels))).astype(jnp.bfloat16)
        self.b1_pad = jnp.pad(self.b1, (0, self.Cp_h - hidden_channels)
                              ).reshape(1, self.Cp_h)

        wt2 = jnp.transpose(self.w2, (0, 2, 1))               # [K, hidden, out]
        self.wt2_pad = jnp.pad(
            wt2, ((0, 0), (0, self.Cp_h - hidden_channels),
                  (0, self.Cp_o - out_channels))).astype(jnp.bfloat16)
        self.b2_pad = jnp.pad(self.b2, (0, self.Cp_o - out_channels)
                              ).reshape(1, self.Cp_o)

    def __call__(self, x, edge_index, edge_weight):
        N = x.shape[0]
        Np = _round_up(N, LANE)
        tile = 256 if Np % 256 == 0 else 128   # 256-wide MXU on v6e/v7x, 128 otherwise
        tm = tk = tile

        l_hat = cheb_norm_dense(edge_index, edge_weight, N)
        l_pad = _pad2d(l_hat, Np, Np).astype(jnp.bfloat16)
        x_pad = _pad2d(x.astype(jnp.float32), Np, self.Cpi1).astype(jnp.bfloat16)

        h = cheb_conv_forward(l_pad, x_pad, self.wt1_pad, self.b1_pad, self.K,
                              relu=True, tm=tm, tk=tk)            # [Np, Cp_h] f32
        # TODO(synk): F.dropout is identity in eval mode; training-mode dropout
        # would fuse pltpu.prng_seed + stateful_bernoulli into the combine kernel.
        h_bf = h.astype(jnp.bfloat16)
        out = cheb_conv_forward(l_pad, h_bf, self.wt2_pad, self.b2_pad, self.K,
                                relu=False, tm=tm, tk=tk)         # [Np, Cp_o] f32
        return out[:N, :self.out_channels]

    # ----------------------------- references ------------------------------ #

    def reference(self, x, edge_index, edge_weight):
        """Pure-f32, unpadded reference (true ChebConv math)."""
        N = x.shape[0]
        l_hat = cheb_norm_dense(edge_index, edge_weight, N)

        def layer(h, w, b, relu):
            wt = jnp.transpose(w, (0, 2, 1))
            tx0, out = h, h @ wt[0]
            tx1 = tx0
            if self.K > 1:
                tx1 = l_hat @ h
                out = out + tx1 @ wt[1]
            for k in range(2, self.K):
                tx2 = 2.0 * (l_hat @ tx1) - tx0
                out = out + tx2 @ wt[k]
                tx0, tx1 = tx1, tx2
            out = out + b
            return jnp.maximum(out, 0.0) if relu else out

        h = layer(x, self.w1, self.b1, True)
        return layer(h, self.w2, self.b2, False)

    def reference_matched(self, x, edge_index, edge_weight):
        """Reference mirroring the kernel's padding / bf16 storage / f32 accum."""
        N = x.shape[0]
        Np = _round_up(N, LANE)
        l_pad = _pad2d(cheb_norm_dense(edge_index, edge_weight, N),
                       Np, Np).astype(jnp.bfloat16)
        x_pad = _pad2d(x.astype(jnp.float32), Np, self.Cpi1).astype(jnp.bfloat16)

        def dot(a, b):
            return jnp.dot(a, b, preferred_element_type=jnp.float32)

        def layer(h_bf, wt_pad, b_pad, relu):
            txs = [h_bf]
            if self.K > 1:
                txs.append(dot(l_pad, h_bf).astype(jnp.bfloat16))
            for _ in range(2, self.K):
                t2 = 2.0 * dot(l_pad, txs[-1]) - txs[-2].astype(jnp.float32)
                txs.append(t2.astype(jnp.bfloat16))
            out = jnp.zeros((Np, wt_pad.shape[2]), jnp.float32)
            for k in range(self.K):
                out = out + dot(txs[k], wt_pad[k])
            out = out + b_pad
            return jnp.maximum(out, 0.0) if relu else out

        h = layer(x_pad, self.wt1_pad, self.b1_pad, True).astype(jnp.bfloat16)
        out = layer(h, self.wt2_pad, self.b2_pad, False)
        return out[:N, :self.out_channels]


# --------------------------------- Main ------------------------------------ #

if __name__ == "__main__":
    key = jax.random.PRNGKey(0)
    k_x, k_ei, k_ew, k_p = jax.random.split(key, 4)

    # Small graph: N nodes, E undirected edges, in -> hidden -> out, K hops.
    N, E = 16, 48
    C_in, C_hid, C_out, K = 8, 32, 4, 3

    x = jax.random.normal(k_x, (N, C_in), jnp.float32)
    src = jax.random.randint(k_ei, (E,), 0, N, dtype=jnp.int32)
    dst = jax.random.randint(jax.random.fold_in(k_ei, 1), (E,), 0, N,
                             dtype=jnp.int32)
    # symmetrize so the 'sym' Laplacian is well-behaved
    edge_index = jnp.concatenate(
        [jnp.stack([src, dst]), jnp.stack([dst, src])], axis=1)   # [2, 2E]
    ew = jax.random.uniform(k_ew, (E,), jnp.float32, 0.5, 1.5)
    edge_weight = jnp.concatenate([ew, ew])                       # [2E]

    model = MyChebyNetPallas(C_in, C_hid, C_out, K, k_p)

    out = jax.block_until_ready(model(x, edge_index, edge_weight))
    assert out.shape == (N, C_out)

    # Tight check: kernel vs a reference using identical bf16/f32 numerics.
    ref_matched = model.reference_matched(x, edge_index, edge_weight)
    assert jnp.allclose(out, ref_matched, atol=5e-3, rtol=5e-3), \
        "mismatch vs bf16-matched reference"

    # Sanity check: bf16 kernel vs pure-f32 math stays within ~1e-1.
    ref_f32 = model.reference(x, edge_index, edge_weight)
    assert jnp.allclose(out, ref_f32, atol=1e-1, rtol=1e-1), \
        "mismatch vs f32 reference"

    print("KERNEL_OK")
</pallas_src>

<mosaic_0001>
module attributes {stable_mosaic.version = 11 : i64} {
  func.func @_cheb_prop_kernel(%arg0: i32, %arg1: i32, %arg2: memref<128x128xbf16, #tpu.memory_space<vmem>>, %arg3: memref<128x128xbf16, #tpu.memory_space<vmem>>, %arg4: memref<128x128xbf16, #tpu.memory_space<vmem>>, %arg5: memref<128x128xbf16, #tpu.memory_space<vmem>>, %arg6: memref<128x128xf32, #tpu.memory_space<vmem>>) attributes {dimension_semantics = [#tpu.dimension_semantics<parallel>, #tpu.dimension_semantics<arbitrary>], iteration_bounds = array<i64: 1, 1>, scalar_prefetch = 0 : i64, scratch_operands = 1 : i64, tpu.core_type = #tpu.core_type<tc>, window_params = [{transform_indices = @transform_0, window_bounds = array<i64: 128, 128>}, {transform_indices = @transform_1, window_bounds = array<i64: 128, 128>}, {transform_indices = @transform_2, window_bounds = array<i64: 128, 128>}, {transform_indices = @transform_3, window_bounds = array<i64: 128, 128>}]} {
    %c0_i32 = arith.constant 0 : i32
    %0 = arith.cmpi eq, %arg1, %c0_i32 : i32
    %1 = arith.extui %0 : i1 to i32
    %c0_i32_0 = arith.constant 0 : i32
    %2 = arith.cmpi ne, %1, %c0_i32_0 : i32
    scf.if %2 {
      %cst_10 = arith.constant 0.000000e+00 : f32
      %12 = vector.broadcast %cst_10 : f32 to vector<128x128xf32>
      %c0_11 = arith.constant 0 : index
      %c0_12 = arith.constant 0 : index
      %13 = vector.load %arg6[%c0_11, %c0_12] : memref<128x128xf32, #tpu.memory_space<vmem>>, vector<128x128xf32>
      tpu.vector_store %arg6[%c0_11, %c0_12], %12 {strides = array<i32>} : memref<128x128xf32, #tpu.memory_space<vmem>>, vector<128x128xf32>,
    } else {
    }
    %c0 = arith.constant 0 : index
    %c0_1 = arith.constant 0 : index
    %3 = vector.load %arg6[%c0, %c0_1] : memref<128x128xf32, #tpu.memory_space<vmem>>, vector<128x128xf32>
    %c0_2 = arith.constant 0 : index
    %c0_3 = arith.constant 0 : index
    %4 = vector.load %arg2[%c0_2, %c0_3] : memref<128x128xbf16, #tpu.memory_space<vmem>>, vector<128x128xbf16>
    %c0_4 = arith.constant 0 : index
    %c0_5 = arith.constant 0 : index
    %5 = vector.load %arg3[%c0_4, %c0_5] : memref<128x128xbf16, #tpu.memory_space<vmem>>, vector<128x128xbf16>
    %cst = arith.constant dense<0.000000e+00> : vector<128x128xf32>
    %6 = tpu.matmul %4, %5, %cst {dimension_numbers = #tpu.dot_dimension_numbers<[1], [0], [0], [1], [0, 0, 1, 1], [], []>} : vector<128x128xbf16>, vector<128x128xbf16>, vector<128x128xf32> -> vector<128x128xf32>
    %7 = arith.addf %3, %6 : vector<128x128xf32>
    %c0_6 = arith.constant 0 : index
    %c0_7 = arith.constant 0 : index
    %8 = vector.load %arg6[%c0_6, %c0_7] : memref<128x128xf32, #tpu.memory_space<vmem>>, vector<128x128xf32>
    tpu.vector_store %arg6[%c0_6, %c0_7], %7 {strides = array<i32>} : memref<128x128xf32, #tpu.memory_space<vmem>>, vector<128x128xf32>,
    %c0_i32_8 = arith.constant 0 : i32
    %9 = arith.cmpi eq, %arg1, %c0_i32_8 : i32
    %10 = arith.extui %9 : i1 to i32
    %c0_i32_9 = arith.constant 0 : i32
    %11 = arith.cmpi ne, %10, %c0_i32_9 : i32
    scf.if %11 {
      %c0_10 = arith.constant 0 : index
      %c0_11 = arith.constant 0 : index
      %12 = vector.load %arg6[%c0_10, %c0_11] : memref<128x128xf32, #tpu.memory_space<vmem>>, vector<128x128xf32>
      %cst_12 = arith.constant 1.000000e+00 : f32
      %13 = vector.broadcast %cst_12 : f32 to vector<128x128xf32>
      %14 = arith.mulf %13, %12 : vector<128x128xf32>
      %15 = arith.truncf %14 : vector<128x128xf32> to vector<128x128xbf16>
      %c0_13 = arith.constant 0 : index
      %c0_14 = arith.constant 0 : index
      %16 = vector.load %arg5[%c0_13, %c0_14] : memref<128x128xbf16, #tpu.memory_space<vmem>>, vector<128x128xbf16>
      tpu.vector_store %arg5[%c0_13, %c0_14], %15 {strides = array<i32>} : memref<128x128xbf16, #tpu.memory_space<vmem>>, vector<128x128xbf16>,
    } else {
    }
    return
  }
  func.func @transform_0(%arg0: i32, %arg1: i32) -> (i32, i32) {
    %c0_i32 = arith.constant 0 : i32
    return %arg0, %arg1 : i32, i32
  }
  func.func @transform_1(%arg0: i32, %arg1: i32) -> (i32, i32) {
    %c0_i32 = arith.constant 0 : i32
    %c0_i32_0 = arith.constant 0 : i32
    return %arg1, %c0_i32 : i32, i32
  }
  func.func @transform_2(%arg0: i32, %arg1: i32) -> (i32, i32) {
    %c0_i32 = arith.constant 0 : i32
    %c0_i32_0 = arith.constant 0 : i32
    return %arg0, %c0_i32 : i32, i32
  }
  func.func @transform_3(%arg0: i32, %arg1: i32) -> (i32, i32) {
    %c0_i32 = arith.constant 0 : i32
    %c0_i32_0 = arith.constant 0 : i32
    return %arg0, %c0_i32 : i32, i32
  }
}

</mosaic_0001>

<bundles_post_ra>
// kernel: tpu_custom_call.1
= control target key start
LH: loop header
LB: loop body
LE: loop exit
PB: predicated region body
PF: predicated region fallthrough
CT: control target
= control target key end

     0   :  { %8 = vsyncpa [#allocation4], 0  ;;  %s835_s0 = inlined_call_operand.hbm [shape: bf16[128,128], index: 0, kind: input, shape index: {}]   ;;  %s836_s1 = inlined_call_operand.hbm [shape: bf16[128,128], index: 1, kind: input, shape index: {}]   ;;  %s837_s2 = inlined_call_operand.hbm [shape: bf16[128,128], index: 2, kind: input, shape index: {}]   ;;  %s838_s3 = inlined_call_operand.hbm [shape: bf16[128,128], index: 3, kind: output, shape index: {}]  }
   0x1   :  { %9 = vsyncpa [#allocation7], 0 }
   0x2   :  { %10 = vsyncpa [#allocation5], 0  ;;  %s742_s12 = smov [#allocation6]   ;;  %s743_s14 = smov [#allocation3]  }
   0x3   :  { %s28_s13 = sshll.u32 %s742_s12, 4  ;;  %s16_s15 = sshll.u32 %s743_s14, 4  ;;  %s29_s13 = int_to_ptr.vmem [resolvable:$true] %s28_s13  ;;  %s768_s15 = int_to_ptr.vmem [resolvable:$true] %s16_s15 }
   0x4   :  { %s648_s18 = scalar_lea.hbm %s836_s1, 1024 }
   0x5   :  { %p649_p0 = scmp.ne.s32.totalorder %s836_s1, %s648_s18  ;;  %p652_p1 = scmp.lt.u32.totalorder %s648_s18, %s836_s1 }
   0x7   :  { %p654_p2 = pnand %p652_p1, %p649_p0 }
   0x9   :  { %657 = shalt.err (!%p654_p2)
}
   0xa   :  { %s658_s23 = scalar_lea.vmem %s29_s13, 1024  ;;  %p663_p4 = scmp.lt.s32.totalorder %s29_s13, %s29_s13 }
   0xb   :  { %p659_p3 = scmp.ne.s32.totalorder %s29_s13, %s658_s23  ;;  %p664_p5 = scmp.lt.s32.totalorder %s658_s23, %s658_s23 }
   0xd   :  { %p665_p6 = por %p664_p5, %p663_p4 }
   0xf   :  { %p666_p7 = pnand %p665_p6, %p659_p3 }
  0x11   :  { %669 = shalt.err (!%p666_p7)
}
  0x12   :  { %s744_s24 = smov 64   ;;  %s745_s25 = smov 4  }
  0x13   :  { %34 = dma.hbm_to_vmem [thread:$0]  %s836_s1, 1024, %s29_s13, [#allocation7], %s744_s24, %s744_s24, %s745_s25  }
  0x14   :  { %s670_s30 = scalar_lea.hbm %s835_s0, 1024 }
  0x15   :  { %p671_p8 = scmp.ne.s32.totalorder %s835_s0, %s670_s30  ;;  %p674_p9 = scmp.lt.u32.totalorder %s670_s30, %s835_s0 }
  0x17   :  { %p676_p10 = pnand %p674_p9, %p671_p8 }
  0x19   :  { %679 = shalt.err (!%p676_p10)
}
  0x1a   :  { %s680_s8 = scalar_lea.vmem %s768_s15, 1024  ;;  %p685_p12 = scmp.lt.s32.totalorder %s768_s15, %s768_s15 }
  0x1b   :  { %p681_p11 = scmp.ne.s32.totalorder %s768_s15, %s680_s8  ;;  %p686_p13 = scmp.lt.s32.totalorder %s680_s8, %s680_s8 }
  0x1d   :  { %p687_p0 = por %p686_p13, %p685_p12 }
  0x1f   :  { %p688_p1 = pnand %p687_p0, %p681_p11 }
  0x21   :  { %691 = shalt.err (!%p688_p1)
}
  0x22   :  { %22 = dma.hbm_to_vmem [thread:$0]  %s835_s0, 1024, %s768_s15, [#allocation4], %s744_s24, %s744_s24, %s745_s25  }
  0x23   :  { %s746_s10 = smov [#allocation8]   ;;  %s692_s14 = scalar_lea.hbm %s837_s2, 1024 }
  0x24   :  { %s40_s11 = sshll.u32 %s746_s10, 4  ;;  %p693_p2 = scmp.ne.s32.totalorder %s837_s2, %s692_s14  ;;  %s41_s11 = int_to_ptr.vmem [resolvable:$true] %s40_s11 }
  0x25   :  { %p696_p3 = scmp.lt.u32.totalorder %s692_s14, %s837_s2 }
  0x27   :  { %p698_p4 = pnand %p696_p3, %p693_p2 }
  0x29   :  { %701 = shalt.err (!%p698_p4)
}
  0x2a   :  { %s702_s20 = scalar_lea.vmem %s41_s11, 1024  ;;  %p707_p6 = scmp.lt.s32.totalorder %s41_s11, %s41_s11 }
  0x2b   :  { %p703_p5 = scmp.ne.s32.totalorder %s41_s11, %s702_s20  ;;  %p708_p7 = scmp.lt.s32.totalorder %s702_s20, %s702_s20 }
  0x2d   :  { %p709_p8 = por %p708_p7, %p707_p6 }
  0x2f   :  { %p710_p9 = pnand %p709_p8, %p703_p5 }
  0x31   :  { %713 = shalt.err (!%p710_p9)
}
  0x32   :  { %46 = dma.hbm_to_vmem [thread:$0]  %s837_s2, 1024, %s41_s11, [#allocation7], %s744_s24, %s744_s24, %s745_s25  }
  0x33   :  { %736 = dma.done.wait [#allocation4], 1024  }
  0x34   :  { %737 = vsyncadd [#allocation4], 4294966272 }
  0x35   :  { %738 = dma.done.wait [#allocation7], 2048  }
  0x36   :  { %739 = vsyncadd [#allocation7], 4294965248  ;;  %v632_v0 = vld [vmem:[#allocation6] sm:$0xff]   ;;  %v633_v1 = vld [vmem:[#allocation6 + $0x8] sm:$0xff]   ;;  %s747_s2 = smov [#allocation9]  }
  0x37   :  { %578 = vmatprep.subr.bf16.mxu0 %v632_v0  ;;  %610 = vmatprep.subr.bf16.mxu1 %v632_v0  ;;  %v634_v2 = vld [vmem:[#allocation6 + $0x10] sm:$0xff]   ;;  %v635_v3 = vld [vmem:[#allocation6 + $0x18] sm:$0xff]   ;;  %v640_v4 = vld [vmem:[#allocation3] sm:$0xff]   ;;  %s454_s21 = sshll.u32 %s747_s2, 4  ;;  %s455_s21 = int_to_ptr.vmem [resolvable:$true] %s454_s21 }
  0x38   :  { %579 = vmatpush3.bf16.msra.mxu0 %v632_v0  ;;  %618 = vmatpush3.bf16.msra.mxu1 %v632_v0  ;;  %v641_v5 = vld [vmem:[#allocation3 + $0x20] sm:$0xff]   ;;  %v637_v7 = vld [vmem:[#allocation6 + $0x28] sm:$0xff]   ;;  %v638_v8 = vld [vmem:[#allocation6 + $0x30] sm:$0xff]   ;;  %s714_s22 = scalar_lea.vmem %s455_s21, 1024  ;;  %p719_p11 = scmp.lt.s32.totalorder %s455_s21, %s455_s21 }
  0x39   :  { %580 = vmatprep.subr.bf16.mxu0 %v633_v1  ;;  %611 = vmatprep.subr.bf16.mxu1 %v633_v1  ;;  %v636_v6 = vld [vmem:[#allocation6 + $0x20] sm:$0xff]   ;;  %v639_v9 = vld [vmem:[#allocation6 + $0x38] sm:$0xff]   ;;  %v642_v10 = vld [vmem:[#allocation3 + $0x8] sm:$0xff]   ;;  %p715_p10 = scmp.ne.s32.totalorder %s455_s21, %s714_s22  ;;  %p720_p12 = scmp.lt.s32.totalorder %s714_s22, %s714_s22 }
  0x3a   :  { %594 = vmatprep.mubr.bf16.mxu0 %v640_v4  ;;  %602 = vmatprep.mubr.bf16.mxu1 %v641_v5  ;;  %v643_v11 = vld [vmem:[#allocation3 + $0x28] sm:$0xff]   ;;  %v644_v12 = vld [vmem:[#allocation3 + $0x10] sm:$0xff]   ;;  %v646_v14 = vld [vmem:[#allocation3 + $0x18] sm:$0xff]  }
  0x3b   :  { %v645_v13 = vld [vmem:[#allocation3 + $0x30] sm:$0xff]   ;;  %v647_v15 = vld [vmem:[#allocation3 + $0x38] sm:$0xff]   ;;  %p721_p13 = por %p720_p12, %p719_p11 }
  0x3c   :  { %581 = vmatpush3.bf16.msra.mxu0 %v633_v1  ;;  %619 = vmatpush3.bf16.msra.mxu1 %v633_v1 }
  0x3d   :  { %582 = vmatprep.subr.bf16.mxu0 %v634_v2  ;;  %612 = vmatprep.subr.bf16.mxu1 %v634_v2  ;;  %p722_p0 = pnand %p721_p13, %p715_p10 }
  0x40   :  { %583 = vmatpush3.bf16.msra.mxu0 %v634_v2  ;;  %620 = vmatpush3.bf16.msra.mxu1 %v634_v2 }
  0x41   :  { %584 = vmatprep.subr.bf16.mxu0 %v635_v3  ;;  %613 = vmatprep.subr.bf16.mxu1 %v635_v3 }
  0x44   :  { %585 = vmatpush3.bf16.msra.mxu0 %v635_v3  ;;  %621 = vmatpush3.bf16.msra.mxu1 %v635_v3 }
  0x45   :  { %586 = vmatprep.subr.bf16.mxu0 %v636_v6  ;;  %614 = vmatprep.subr.bf16.mxu1 %v636_v6 }
  0x48   :  { %587 = vmatpush3.bf16.msra.mxu0 %v636_v6  ;;  %622 = vmatpush3.bf16.msra.mxu1 %v636_v6 }
  0x49   :  { %588 = vmatprep.subr.bf16.mxu0 %v637_v7  ;;  %615 = vmatprep.subr.bf16.mxu1 %v637_v7 }
  0x4c   :  { %589 = vmatpush3.bf16.msra.mxu0 %v637_v7  ;;  %623 = vmatpush3.bf16.msra.mxu1 %v637_v7 }
  0x4d   :  { %590 = vmatprep.subr.bf16.mxu0 %v638_v8  ;;  %616 = vmatprep.subr.bf16.mxu1 %v638_v8 }
  0x50   :  { %591 = vmatpush3.bf16.msra.mxu0 %v638_v8  ;;  %624 = vmatpush3.bf16.msra.mxu1 %v638_v8 }
  0x51   :  { %592 = vmatprep.subr.bf16.mxu0 %v639_v9  ;;  %617 = vmatprep.subr.bf16.mxu1 %v639_v9 }
  0x54   :  { %593 = vmatpush3.bf16.msra.mxu0 %v639_v9  ;;  %625 = vmatpush3.bf16.msra.mxu1 %v639_v9 }
  0x57   :  { %595 = vmatmul.mubr.bf16.vlgmr.msra.gmra.mrb[0].mxu0 %v642_v10  ;;  %603 = vmatmul.mubr.bf16.vlgmr.msra.gmra.mrb[0].mxu1 %v643_v11 }
  0x58   :  { %598 = vmatprep.mubr.bf16.mxu0 %v644_v12  ;;  %606 = vmatprep.mubr.bf16.mxu1 %v645_v13 }
  0x5f   :  { %599 = vmatmul.mubr.bf16.gmra.mrb[4].mxu0 %v646_v14  ;;  %607 = vmatmul.mubr.bf16.gmra.mrb[4].mxu1 %v647_v15 }
 0x12a   :  { %v596_v16 = vpop.f32.mrb[0].mxu0  ;;  %v604_v17 = vpop.f32.mrb[0].mxu1 }
 0x12b   :  { %v255_v18 = vpop.f32.mrb[1].mxu0  ;;  %v287_v19 = vpop.f32.mrb[1].mxu1 }
 0x12c   :  { %v597_v20 = vpop.f32.mrb[2].mxu0  ;;  %v605_v21 = vpop.f32.mrb[2].mxu1 }
 0x12d   :  { %v523_v22 = vpack.c.bf16 %v597_v20, %v596_v16  ;;  %v543_v23 = vpack.c.bf16 %v605_v21, %v604_v17  ;;  %v258_v24 = vpop.f32.mrb[3].mxu0  ;;  %v290_v25 = vpop.f32.mrb[3].mxu1 }
 0x12e   :  { %v518_v26 = vpack.c.bf16 %v258_v24, %v255_v18  ;;  %v538_v27 = vpack.c.bf16 %v290_v25, %v287_v19 }
 0x12f   :  { %555 = vst [vmem:[#allocation9 + $0x8] sm:$0xff] %v523_v22   ;;  %559 = vst [vmem:[#allocation9 + $0x28] sm:$0xff] %v543_v23  }
 0x130   :  { %519 = vst [vmem:[#allocation9] sm:$0xff] %v518_v26   ;;  %558 = vst [vmem:[#allocation9 + $0x20] sm:$0xff] %v538_v27  }
 0x132   :  { %v600_v28 = vpop.f32.mrb[4].mxu0  ;;  %v608_v29 = vpop.f32.mrb[4].mxu1 }
 0x133   :  { %v271_v30 = vpop.f32.mrb[5].mxu0  ;;  %v303_v31 = vpop.f32.mrb[5].mxu1 }
 0x134   :  { %v601_v32 = vpop.f32.mrb[6].mxu0  ;;  %v609_v33 = vpop.f32.mrb[6].mxu1 }
 0x135   :  { %v533_v34 = vpack.c.bf16 %v601_v32, %v600_v28  ;;  %v553_v35 = vpack.c.bf16 %v609_v33, %v608_v29  ;;  %v274_v36 = vpop.f32.mrb[7].mxu0  ;;  %v306_v37 = vpop.f32.mrb[7].mxu1 }
 0x136   :  { %v528_v38 = vpack.c.bf16 %v274_v36, %v271_v30  ;;  %v548_v39 = vpack.c.bf16 %v306_v37, %v303_v31 }
 0x137   :  { %557 = vst [vmem:[#allocation9 + $0x18] sm:$0xff] %v533_v34   ;;  %561 = vst [vmem:[#allocation9 + $0x38] sm:$0xff] %v553_v35  }
 0x138   :  { %556 = vst [vmem:[#allocation9 + $0x10] sm:$0xff] %v528_v38   ;;  %560 = vst [vmem:[#allocation9 + $0x30] sm:$0xff] %v548_v39  }
 0x139   :  { %725 = shalt.err (!%p722_p0)
}
 0x13a   :  { %s726_s27 = scalar_lea.hbm %s838_s3, 1024 }
 0x13b   :  { %p727_p1 = scmp.ne.s32.totalorder %s838_s3, %s726_s27  ;;  %p730_p2 = scmp.lt.u32.totalorder %s726_s27, %s838_s3 }
 0x13d   :  { %p732_p3 = pnand %p730_p2, %p727_p1 }
 0x13f   :  { %735 = shalt.err (!%p732_p3)
}
 0x140   :  { %460 = dma.vmem_to_hbm [thread:$0]  %s455_s21, 1024, %s838_s3, [#allocation5], %s744_s24, %s744_s24, %s745_s25  }
 0x141   :  { %740 = dma.done.wait [#allocation5], 1024  }
 0x142   :  { %741 = vsyncadd [#allocation5], 4294966272 }
 0x143   :  { %464 = vsyncpa [#allocation4], 1 }
 0x144   :  { %465 = vsyncpa [#allocation7], 1 }
 0x145   :  { %466 = vsyncpa [#allocation5], 1 }

</bundles_post_ra>
